<compile_context>
chip_gen: v5e
topology: v5e:2x2
jax: 0.10.0
libtpu: 0.0.40
codegen_flags: <defaults>
</compile_context>

<pallas_src>
from math import pi

import jax
import jax.numpy as jnp
from jax.experimental import pallas as pl
from jax.experimental.pallas import tpu as pltpu

LANES = 128  # lane-dense padding target for all feature dims


def _round_up(n: int, m: int) -> int:
    return ((n + m - 1) // m) * m


# --------------------------------------------------------------------------
# Kernel
# --------------------------------------------------------------------------
def hybrid_ae_kernel(x_ref, w1_ref, w2_ref, c_ref, o_ref):
    # x tile: (TB, 128) f32 -> bf16 for the MXU (f32 accumulate).
    x = x_ref[...].astype(jnp.bfloat16)

    # Packed per-lane constants (VMEM-resident, one operand).
    b1h = c_ref[0:1, :]     # 0.5 * fc1 bias (live lanes), zeros elsewhere
    phi1 = c_ref[1:2, :]    # pi/2 + th1 (live lanes)
    phi2 = c_ref[2:3, :]    # pi/2 + th2 (live lanes)
    b2 = c_ref[3:4, :]      # fc2 bias + folded dead-lane contribution

    # ---- embed() ----
    # z' = x @ (W1/2) + b1/2 ;  sigmoid(2z')*pi + th1 == (pi/2)*tanh(z') + phi1
    z = jnp.dot(x, w1_ref[...], preferred_element_type=jnp.float32) + b1h
    q1 = jnp.cos((pi / 2.0) * jnp.tanh(z) + phi1)          # surrogate q_layer1

    # ---- reconstruct() ----
    # ((q1/2 + 0.5)*pi) + th2 == (pi/2)*q1 + phi2 on live lanes; masked lanes
    # are constant and already folded into b2 host-side.
    q2 = jnp.cos((pi / 2.0) * q1 + phi2)                   # surrogate q_layer2
    o_ref[...] = jnp.dot(q2.astype(jnp.bfloat16), w2_ref[...],
                         preferred_element_type=jnp.float32) + b2


# --------------------------------------------------------------------------
# Host-side parameter packing / constant folding
# --------------------------------------------------------------------------
def pack_params(w1, b1, th1, th2, w2, b2, embedding_size):
    """Fold constants and pad everything lane-dense (128 lanes)."""
    input_size, q_num = w1.shape
    e = embedding_size

    # Only the first `embedding_size` hidden lanes are live (the slice +
    # zero-pad concat in the module).  Dead lanes contribute the constant
    # cos(th2) @ W2 row, which we fold into the output bias.
    b2_eff = b2 + jnp.cos(th2[e:]) @ w2[e:, :]

    # Fold the sigmoid->tanh half-argument scale into W1 / b1.
    w1p = jnp.zeros((LANES, LANES), jnp.bfloat16)
    w1p = w1p.at[:input_size, :e].set((0.5 * w1[:, :e]).astype(jnp.bfloat16))

    w2p = jnp.zeros((LANES, LANES), jnp.bfloat16)
    w2p = w2p.at[:e, :input_size].set(w2[:e, :].astype(jnp.bfloat16))

    consts = jnp.zeros((8, LANES), jnp.float32)
    consts = consts.at[0, :e].set(0.5 * b1[:e])
    consts = consts.at[1, :e].set(pi / 2.0 + th1[:e])
    consts = consts.at[2, :e].set(pi / 2.0 + th2[:e])
    consts = consts.at[3, :input_size].set(b2_eff)
    return w1p, w2p, consts


# --------------------------------------------------------------------------
# Forward wrapper
# --------------------------------------------------------------------------
@jax.jit
def hybrid_autoencoder_forward(x, w1p, w2p, consts):
    b, input_size = x.shape
    in_pad, h_pad = w1p.shape
    out_pad = w2p.shape[1]

    # Batch tile: up to 512 rows, sublane-aligned; pad batch to a multiple.
    tb = min(512, _round_up(b, 8))
    b_pad = _round_up(b, tb)

    x_pad = jnp.pad(x.astype(jnp.float32),
                    ((0, b_pad - b), (0, in_pad - input_size)))

    cost = pl.CostEstimate(
        flops=2 * b_pad * (in_pad * h_pad + h_pad * out_pad),
        transcendentals=3 * b_pad * h_pad,          # tanh + 2x cos per element
        bytes_accessed=(b_pad * in_pad * 4 + b_pad * out_pad * 4
                        + w1p.size * 2 + w2p.size * 2 + consts.size * 4),
    )

    out = pl.pallas_call(
        hybrid_ae_kernel,
        out_shape=jax.ShapeDtypeStruct((b_pad, out_pad), jnp.float32),
        grid=(b_pad // tb,),
        in_specs=[
            pl.BlockSpec((tb, in_pad), lambda i: (i, 0)),       # x tile
            pl.BlockSpec((in_pad, h_pad), lambda i: (0, 0)),    # W1 resident
            pl.BlockSpec((h_pad, out_pad), lambda i: (0, 0)),   # W2 resident
            pl.BlockSpec(consts.shape, lambda i: (0, 0)),       # packed consts
        ],
        out_specs=pl.BlockSpec((tb, out_pad), lambda i: (i, 0)),
        compiler_params=pltpu.CompilerParams(
            dimension_semantics=("parallel",),
        ),
        cost_estimate=cost,
    )(x_pad, w1p, w2p, consts)

    return out[:b, :input_size]


# --------------------------------------------------------------------------
# Pure-JAX reference (unfolded surrogate, matches the module's forward)
# --------------------------------------------------------------------------
def reference_forward(x, w1, b1, th1, th2, w2, b2, embedding_size):
    q_num = w1.shape[1]
    h = jax.nn.sigmoid(x @ w1 + b1) * pi
    q1 = jnp.cos(h + th1)                          # surrogate q_layer1
    emb = (q1 / 2.0 + 0.5) * pi
    mask = (jnp.arange(q_num) < embedding_size).astype(x.dtype)
    emb = emb * mask                               # slice + zero-pad concat
    q2 = jnp.cos(emb + th2)                        # surrogate q_layer2
    return q2 @ w2 + b2


if __name__ == "__main__":
    # Small, forward-consistent shapes.
    batch = 2
    input_size = 16
    q_num = 8
    embedding_size = 4

    key = jax.random.PRNGKey(0)
    k1, k2, k3, k4, k5, k6 = jax.random.split(key, 6)

    # fc1: Linear(input_size, q_num)  -> W1 (input_size, q_num), b1 (q_num)
    # fc2: Linear(q_num, input_size)  -> W2 (q_num, input_size), b2 (input_size)
    w1 = jax.random.normal(k1, (input_size, q_num), jnp.float32) * 0.1
    b1 = jax.random.normal(k2, (q_num,), jnp.float32) * 0.1
    w2 = jax.random.normal(k3, (q_num, input_size), jnp.float32) * 0.1
    b2 = jax.random.normal(k4, (input_size,), jnp.float32) * 0.1
    # Surrogate quantum-layer angles (one per wire).
    th1 = jax.random.uniform(k5, (q_num,), jnp.float32, 0.0, pi)
    th2 = jax.random.uniform(k6, (q_num,), jnp.float32, 0.0, pi)

    x = jax.random.normal(jax.random.PRNGKey(42), (batch, input_size),
                          jnp.float32)

    w1p, w2p, consts = pack_params(w1, b1, th1, th2, w2, b2, embedding_size)

    out = hybrid_autoencoder_forward(x, w1p, w2p, consts)
    out = jax.block_until_ready(out)

    ref = reference_forward(x, w1, b1, th1, th2, w2, b2, embedding_size)
    assert out.shape == (batch, input_size)
    # bf16 MXU operands -> loose-ish tolerance vs the f32 reference.
    assert jnp.allclose(out, ref, atol=2e-2, rtol=2e-2), "mismatch vs reference"

    print("KERNEL_OK")
</pallas_src>

<mosaic_0001>
module attributes {stable_mosaic.version = 11 : i64} {
  func.func @hybrid_ae_kernel(%arg0: i32, %arg1: memref<8x128xf32, #tpu.memory_space<vmem>>, %arg2: memref<128x128xbf16, #tpu.memory_space<vmem>>, %arg3: memref<128x128xbf16, #tpu.memory_space<vmem>>, %arg4: memref<8x128xf32, #tpu.memory_space<vmem>>, %arg5: memref<8x128xf32, #tpu.memory_space<vmem>>) attributes {dimension_semantics = [#tpu.dimension_semantics<parallel>], iteration_bounds = array<i64: 1>, scalar_prefetch = 0 : i64, scratch_operands = 0 : i64, tpu.core_type = #tpu.core_type<tc>, window_params = [{transform_indices = @transform_0, window_bounds = array<i64: 8, 128>}, {pipeline_mode = #tpu.pipeline_mode<synchronous>, transform_indices = @transform_1, window_bounds = array<i64: 128, 128>}, {pipeline_mode = #tpu.pipeline_mode<synchronous>, transform_indices = @transform_2, window_bounds = array<i64: 128, 128>}, {pipeline_mode = #tpu.pipeline_mode<synchronous>, transform_indices = @transform_3, window_bounds = array<i64: 8, 128>}, {transform_indices = @transform_4, window_bounds = array<i64: 8, 128>}]} {
    %c0 = arith.constant 0 : index
    %c0_0 = arith.constant 0 : index
    %0 = vector.load %arg1[%c0, %c0_0] : memref<8x128xf32, #tpu.memory_space<vmem>>, vector<8x128xf32>
    %1 = arith.truncf %0 : vector<8x128xf32> to vector<8x128xbf16>
    %c0_1 = arith.constant 0 : index
    %c0_2 = arith.constant 0 : index
    %2 = vector.load %arg4[%c0_1, %c0_2] : memref<8x128xf32, #tpu.memory_space<vmem>>, vector<1x128xf32>
    %c1 = arith.constant 1 : index
    %c0_3 = arith.constant 0 : index
    %3 = vector.load %arg4[%c1, %c0_3] : memref<8x128xf32, #tpu.memory_space<vmem>>, vector<1x128xf32>
    %c2 = arith.constant 2 : index
    %c0_4 = arith.constant 0 : index
    %4 = vector.load %arg4[%c2, %c0_4] : memref<8x128xf32, #tpu.memory_space<vmem>>, vector<1x128xf32>
    %c3 = arith.constant 3 : index
    %c0_5 = arith.constant 0 : index
    %5 = vector.load %arg4[%c3, %c0_5] : memref<8x128xf32, #tpu.memory_space<vmem>>, vector<1x128xf32>
    %c0_6 = arith.constant 0 : index
    %c0_7 = arith.constant 0 : index
    %6 = vector.load %arg2[%c0_6, %c0_7] : memref<128x128xbf16, #tpu.memory_space<vmem>>, vector<128x128xbf16>
    %cst = arith.constant dense<0.000000e+00> : vector<8x128xf32>
    %7 = tpu.matmul %1, %6, %cst {dimension_numbers = #tpu.dot_dimension_numbers<[1], [0], [0], [1], [0, 0, 1, 1], [], []>} : vector<8x128xbf16>, vector<128x128xbf16>, vector<8x128xf32> -> vector<8x128xf32>
    %8 = vector.broadcast %2 : vector<1x128xf32> to vector<8x128xf32>
    %9 = arith.addf %7, %8 : vector<8x128xf32>
    %10 = math.tanh %9 : vector<8x128xf32>
    %cst_8 = arith.constant 1.57079637 : f32
    %11 = vector.broadcast %cst_8 : f32 to vector<8x128xf32>
    %12 = arith.mulf %11, %10 : vector<8x128xf32>
    %13 = vector.broadcast %3 : vector<1x128xf32> to vector<8x128xf32>
    %14 = arith.addf %12, %13 : vector<8x128xf32>
    %15 = math.cos %14 : vector<8x128xf32>
    %cst_9 = arith.constant 1.57079637 : f32
    %16 = vector.broadcast %cst_9 : f32 to vector<8x128xf32>
    %17 = arith.mulf %16, %15 : vector<8x128xf32>
    %18 = vector.broadcast %4 : vector<1x128xf32> to vector<8x128xf32>
    %19 = arith.addf %17, %18 : vector<8x128xf32>
    %20 = math.cos %19 : vector<8x128xf32>
    %21 = arith.truncf %20 : vector<8x128xf32> to vector<8x128xbf16>
    %c0_10 = arith.constant 0 : index
    %c0_11 = arith.constant 0 : index
    %22 = vector.load %arg3[%c0_10, %c0_11] : memref<128x128xbf16, #tpu.memory_space<vmem>>, vector<128x128xbf16>
    %cst_12 = arith.constant dense<0.000000e+00> : vector<8x128xf32>
    %23 = tpu.matmul %21, %22, %cst_12 {dimension_numbers = #tpu.dot_dimension_numbers<[1], [0], [0], [1], [0, 0, 1, 1], [], []>} : vector<8x128xbf16>, vector<128x128xbf16>, vector<8x128xf32> -> vector<8x128xf32>
    %24 = vector.broadcast %5 : vector<1x128xf32> to vector<8x128xf32>
    %25 = arith.addf %23, %24 : vector<8x128xf32>
    %c0_13 = arith.constant 0 : index
    %c0_14 = arith.constant 0 : index
    %26 = vector.load %arg5[%c0_13, %c0_14] : memref<8x128xf32, #tpu.memory_space<vmem>>, vector<8x128xf32>
    tpu.vector_store %arg5[%c0_13, %c0_14], %25 {strides = array<i32>} : memref<8x128xf32, #tpu.memory_space<vmem>>, vector<8x128xf32>,
    return
  }
  func.func @transform_0(%arg0: i32) -> (i32, i32) {
    %c0_i32 = arith.constant 0 : i32
    %c0_i32_0 = arith.constant 0 : i32
    return %arg0, %c0_i32 : i32, i32
  }
  func.func @transform_1(%arg0: i32) -> (i32, i32) {
    %c0_i32 = arith.constant 0 : i32
    %c0_i32_0 = arith.constant 0 : i32
    %c0_i32_1 = arith.constant 0 : i32
    return %c0_i32, %c0_i32_0 : i32, i32
  }
  func.func @transform_2(%arg0: i32) -> (i32, i32) {
    %c0_i32 = arith.constant 0 : i32
    %c0_i32_0 = arith.constant 0 : i32
    %c0_i32_1 = arith.constant 0 : i32
    return %c0_i32, %c0_i32_0 : i32, i32
  }
  func.func @transform_3(%arg0: i32) -> (i32, i32) {
    %c0_i32 = arith.constant 0 : i32
    %c0_i32_0 = arith.constant 0 : i32
    %c0_i32_1 = arith.constant 0 : i32
    return %c0_i32, %c0_i32_0 : i32, i32
  }
  func.func @transform_4(%arg0: i32) -> (i32, i32) {
    %c0_i32 = arith.constant 0 : i32
    %c0_i32_0 = arith.constant 0 : i32
    return %arg0, %c0_i32 : i32, i32
  }
}

</mosaic_0001>

<bundles_post_ra>
// kernel: hybrid_autoencoder_forward.1
= control target key start
LH: loop header
LB: loop body
LE: loop exit
PB: predicated region body
PF: predicated region fallthrough
CT: control target
= control target key end

     0   :  { %9 = vsyncpa [#allocation3], 0  ;;  %s899_s0 = inlined_call_operand.vmem [shape: f32[8,128], index: 0, kind: input, shape index: {}]   ;;  %s900_s1 = inlined_call_operand.hbm [shape: bf16[128,128], index: 1, kind: input, shape index: {}]   ;;  %s901_s2 = inlined_call_operand.hbm [shape: bf16[128,128], index: 2, kind: input, shape index: {}]   ;;  %s902_s3 = inlined_call_operand.vmem [shape: f32[8,128], index: 3, kind: input, shape index: {}]   ;;  %s903_s4 = inlined_call_operand.vmem [shape: f32[8,128], index: 4, kind: output, shape index: {}]  }
   0x1   :  { %s17_s17 = sshll.u32 %s900_s1, 4  ;;  %s18_s17 = int_to_ptr.hbm [resolvable:$true] %s17_s17 }
   0x2   :  { %10 = vsyncpa [#allocation5], 0  ;;  %s689_s18 = smov [#allocation2]   ;;  %s30_s22 = sshll.u32 %s901_s2, 4  ;;  %s31_s22 = int_to_ptr.hbm [resolvable:$true] %s30_s22 }
   0x3   :  { %s19_s19 = sshll.u32 %s689_s18, 4  ;;  %s690_s23 = smov 64   ;;  %s20_s19 = int_to_ptr.vmem [resolvable:$true] %s19_s19 }
   0x4   :  { %s691_s24 = smov 4   ;;  %s692_s25 = smov [#allocation4]  }
   0x5   :  { %25 = dma.hbm_to_vmem [thread:$0]  %s18_s17, 1024, %s20_s19, [#allocation3], %s690_s23, %s690_s23, %s691_s24  }
   0x6   :  { %s32_s26 = sshll.u32 %s692_s25, 4  ;;  %s33_s26 = int_to_ptr.vmem [resolvable:$true] %s32_s26 }
   0x7   :  { %38 = dma.hbm_to_vmem [thread:$0]  %s31_s22, 1024, %s33_s26, [#allocation5], %s690_s23, %s690_s23, %s691_s24  }
   0x8   :  { %685 = dma.done.wait [#allocation3], 1024  }
   0x9   :  { %686 = vsyncadd [#allocation3], 4294966272 }
   0xa   :  { %687 = dma.done.wait [#allocation5], 1024  }
   0xb   :  { %688 = vsyncadd [#allocation5], 4294966272  ;;  %v611_v0 = vld [vmem:[#allocation2 + $0x38] sm:$0xff]  ;;  %v610_v1 = vld [vmem:[#allocation2 + $0x30] sm:$0xff]  ;;  %v693_v29 = vmov 683565275  }
   0xc   :  { %120 = vmatpush.bf16.msra.mxu0 %v611_v0  ;;  %v609_v2 = vld [vmem:[#allocation2 + $0x28] sm:$0xff]  ;;  %v608_v3 = vld [vmem:[#allocation2 + $0x20] sm:$0xff]  ;;  %v607_v4 = vld [vmem:[#allocation2 + $0x18] sm:$0xff]  ;;  %v694_v31 = vmov 2475754826  }
   0xd   :  { %v606_v5 = vld [vmem:[#allocation2 + $0x10] sm:$0xff]  ;;  %v605_v6 = vld [vmem:[#allocation2 + $0x8] sm:$0xff]  ;;  %v604_v7 = vld [vmem:[#allocation2] sm:$0xff]  ;;  %v695_v34 = vmov 2131351028  }
   0xe   :  { %v49_v8 = vld [vmem:[%s899_s0] sm:$0xff]  ;;  %v696_v37 = vmov 2102212464   ;;  %v697_v40 = vmov 920167782  }
   0xf   :  { %v50_v9 = vpack.c.bf16 %v49_v8, %v49_v8  ;;  %v631_v10 = vld [vmem:[%s902_s3] ss:$0 sm:$0xff]  ;;  %v632_v13 = vld [vmem:[%s902_s3 + $0x1] ss:$0 sm:$0xff]  ;;  %v698_v43 = vmov 1326507024  }
  0x10   :  { %121 = vmatpush.bf16.msra.mxu0 %v610_v1 }
  0x14   :  { %122 = vmatpush.bf16.msra.mxu0 %v609_v2 }
  0x18   :  { %123 = vmatpush.bf16.msra.mxu0 %v608_v3 }
  0x1c   :  { %124 = vmatpush.bf16.msra.mxu0 %v607_v4 }
  0x20   :  { %125 = vmatpush.bf16.msra.mxu0 %v606_v5 }
  0x24   :  { %126 = vmatpush.bf16.msra.mxu0 %v605_v6 }
  0x28   :  { %127 = vmatpush.bf16.msra.mxu0 %v604_v7 }
  0x2b   :  { %128 = vmatmul.bf16.vlgmr.msra.gmra.mxu0 %v50_v9 }
  0xa8   :  { %v129_v11 = vpop.f32.mrf.mxu0 }
  0xa9   :  { %v130_v12 = vadd.f32 %v631_v10, %v129_v11 }
  0xab   :  { %635 = vtanh.f32 %v130_v12 }
  0xb0   :  { %v131_v14 = vpop.f32.mrf.mxu0 }
  0xb1   :  { %v636_v15 = vpop.eup %635 }
  0xb2   :  { %v134_v16 = vmul.f32 1.5707964, %v636_v15 }
  0xb4   :  { %v740_v17 = vadd.f32 %v632_v13, %v134_v16  ;;  %v699_v13 = vmov 0  }
  0xb6   :  { %v140_v18 = vand.u32 2139095040, %v740_v17  ;;  %v137_v21 = vand.u32 2147483647, %v740_v17  ;;  %vm139_vm12 = vcmp.lt.s32.totalorder %v740_v17, 0 }
  0xb8   :  { %v141_v19 = vshrl.u32 %v140_v18, 23  ;;  %v144_v23 = vand.u32 8388607, %v137_v21  ;;  %vm807_vm13 = vcmp.le.f32.partialorder %v137_v21, 0.7853982 }
  0xba   :  { %v566_v20 = vadd.s32 4294967169, %v141_v19  ;;  %v145_v27 = vor.u32 8388608, %v144_v23 }
  0xbc   :  { %v147_v22 = vadd.s32 1, %v566_v20  ;;  %v766_v50 = vshll.u32 %v145_v27, 8 }
  0xbe   :  { %vm148_vm0 = vcmp.gt.s32.totalorder %v147_v22, 0  ;;  %v186_v59 = vand.u32 65535, %v766_v50  ;;  %v187_v60 = vshrl.u32 %v766_v50, 16 }
  0xbf   :  { %v149_v24 = vsel %vm148_vm0, %v147_v22, 0 }
  0xc0   :  { %v151_v25 = vand.u32 31, %v149_v24  ;;  %v748_v28 = vshrl.u32 %v149_v24, 5 }
  0xc2   :  { %v746_v26 = vsub.s32 32, %v151_v25  ;;  %v154_v30 = vshll.u32 %v693_v29, %v151_v25  ;;  %v157_v32 = vshll.u32 %v694_v31, %v151_v25  ;;  %v160_v36 = vshll.u32 %v695_v34, %v151_v25 }
  0xc3   :  { %v163_v39 = vshll.u32 %v696_v37, %v151_v25  ;;  %v166_v42 = vshll.u32 %v697_v40, %v151_v25  ;;  %vm169_vm1 = vcmp.lt.s32.totalorder %v748_v28, 1  ;;  %vm172_vm2 = vcmp.lt.s32.totalorder %v748_v28, 4 }
  0xc4   :  { %v155_v33 = vshrl.u32 %v694_v31, %v746_v26  ;;  %v158_v35 = vshrl.u32 %v695_v34, %v746_v26  ;;  %v161_v38 = vshrl.u32 %v696_v37, %v746_v26  ;;  %v164_v41 = vshrl.u32 %v697_v40, %v746_v26 }
  0xc5   :  { %v167_v44 = vshrl.u32 %v698_v43, %v746_v26  ;;  %vm171_vm3 = vcmp.lt.s32.totalorder %v748_v28, 3  ;;  %vm170_vm4 = vcmp.lt.s32.totalorder %v748_v28, 2  ;;  %v153_v24 = vshrl.u32 %v693_v29, %v746_v26 }
  0xc6   :  { %v156_v45 = vor.u32 %v155_v33, %v154_v30  ;;  %v159_v46 = vor.u32 %v158_v35, %v157_v32  ;;  %v162_v47 = vor.u32 %v161_v38, %v160_v36  ;;  %v165_v48 = vor.u32 %v164_v41, %v163_v39 }
  0xc7   :  { %v168_v49 = vor.u32 %v167_v44, %v166_v42 }
  0xc8   :  { %v177_v51 = vsel %vm169_vm1, %v156_v45, %v159_v46  ;;  %v181_v52 = vsel %vm169_vm1, %v159_v46, %v162_v47  ;;  %v178_v53 = vsel %vm172_vm2, %v165_v48, 920167782  ;;  %v174_v20 = vsel %vm172_vm2, %v162_v47, 2102212464 }
  0xc9   :  { %v182_v54 = vsel %vm172_vm2, %v168_v49, 1326507024  ;;  %v179_v55 = vsel %vm171_vm3, %v162_v47, %v178_v53  ;;  %v173_v35 = vsel %vm169_vm1, %v153_v24, %v156_v45  ;;  %v175_v36 = vsel %vm171_vm3, %v159_v46, %v174_v20  ;;  %v614_v20 = vld [vmem:[#allocation4 + $0x10] sm:$0xff] }
  0xca   :  { %v183_v56 = vsel %vm171_vm3, %v165_v48, %v182_v54  ;;  %v180_v57 = vsel %vm170_vm4, %v177_v51, %v179_v55  ;;  %v176_v26 = vsel %vm170_vm4, %v173_v35, %v175_v36  ;;  %vm280_vm1 = vweird.f32 %v740_v17 }
  0xcb   :  { %v184_v58 = vsel %vm170_vm4, %v181_v52, %v183_v56  ;;  %v210_v63 = vand.u32 65535, %v180_v57  ;;  %v211_v0 = vshrl.u32 %v180_v57, 16  ;;  %v230_v51 = vmul.u32 %v766_v50, %v176_v26 }
  0xcc   :  { %v188_v61 = vand.u32 65535, %v184_v58  ;;  %v189_v62 = vshrl.u32 %v184_v58, 16 }
  0xcd   :  { %v213_v3 = vmul.u32 %v211_v0, %v186_v59  ;;  %v214_v4 = vmul.u32 %v210_v63, %v187_v60  ;;  %v212_v8 = vmul.u32 %v210_v63, %v186_v59  ;;  %v215_v12 = vmul.u32 %v211_v0, %v187_v60  ;;  %v619_v63 = vld [vmem:[#allocation4 + $0x38] sm:$0xff] }
  0xce   :  { %v191_v1 = vmul.u32 %v189_v62, %v186_v59  ;;  %v192_v2 = vmul.u32 %v188_v61, %v187_v60  ;;  %v190_v5 = vmul.u32 %v188_v61, %v186_v59  ;;  %v193_v7 = vmul.u32 %v189_v62, %v187_v60  ;;  %514 = vmatpush.bf16.msra.mxu1 %v619_v63 }
  0xcf   :  { %v216_v9 = vshll.u32 %v213_v3, 16  ;;  %v218_v15 = vshll.u32 %v214_v4, 16  ;;  %v217_v32 = vshrl.u32 %v213_v3, 16  ;;  %v219_v41 = vshrl.u32 %v214_v4, 16 }
  0xd0   :  { %v194_v6 = vshll.u32 %v191_v1, 16  ;;  %v196_v10 = vshll.u32 %v192_v2, 16  ;;  %v195_v25 = vshrl.u32 %v191_v1, 16  ;;  %v197_v38 = vshrl.u32 %v192_v2, 16  ;;  %v618_v2 = vld [vmem:[#allocation4 + $0x30] sm:$0xff] }
  0xd1   :  { %vm220_vm6 = vc.u32 %v212_v8, %v216_v9  ;;  %v222_v16 = vadd.s32 %v216_v9, %v212_v8 }
  0xd2   :  { %vm198_vm5 = vc.u32 %v190_v5, %v194_v6  ;;  %v200_v11 = vadd.s32 %v194_v6, %v190_v5  ;;  %v221_v19 = vsel %vm220_vm6, 1, %v699_v13  ;;  %515 = vmatpush.bf16.msra.mxu1 %v618_v2  ;;  %v617_v6 = vld [vmem:[#allocation4 + $0x28] sm:$0xff] }
  0xd3   :  { %v199_v14 = vsel %vm198_vm5, 1, %v699_v13  ;;  %v223_v23 = vadd.s32 %v221_v19, %v215_v12  ;;  %vm224_vm8 = vc.u32 %v222_v16, %v218_v15  ;;  %v226_v47 = vadd.s32 %v222_v16, %v218_v15  ;;  %v615_v15 = vld [vmem:[#allocation4 + $0x18] sm:$0xff] }
  0xd4   :  { %v201_v18 = vadd.s32 %v199_v14, %v193_v7  ;;  %vm202_vm7 = vc.u32 %v200_v11, %v196_v10  ;;  %v225_v30 = vsel %vm224_vm8, 1, %v699_v13  ;;  %v616_v10 = vld [vmem:[#allocation4 + $0x20] sm:$0xff] }
  0xd5   :  { %v203_v22 = vsel %vm202_vm7, 1, %v699_v13  ;;  %v227_v33 = vadd.s32 %v225_v30, %v223_v23 }
  0xd6   :  { %v205_v27 = vadd.s32 %v203_v22, %v201_v18  ;;  %516 = vmatpush.bf16.msra.mxu1 %v617_v6 }
  0xd7   :  { %v228_v42 = vadd.s32 %v227_v33, %v217_v32 }
  0xd8   :  { %v206_v39 = vadd.s32 %v205_v27, %v195_v25  ;;  %v613_v27 = vld [vmem:[#allocation4 + $0x8] sm:$0xff] }
  0xd9   :  { %v229_v48 = vadd.s32 %v228_v42, %v219_v41 }
  0xda   :  { %v207_v44 = vadd.s32 %v206_v39, %v197_v38  ;;  %517 = vmatpush.bf16.msra.mxu1 %v616_v10  ;;  %v612_v39 = vld [vmem:[#allocation4] sm:$0xff] }
  0xdb   :  { %v233_v49 = vadd.s32 1, %v229_v48 }
  0xdc   :  { %vm232_vm9 = vc.u32 %v207_v44, %v226_v47  ;;  %v231_v28 = vadd.s32 %v226_v47, %v207_v44 }
  0xdd   :  { %v234_v52 = vsel %vm232_vm9, %v233_v49, %v229_v48 }
  0xde   :  { %v235_v53 = vadd.s32 %v234_v52, %v230_v51  ;;  %518 = vmatpush.bf16.msra.mxu1 %v615_v15 }
  0xe0   :  { %v236_v45 = vadd.s32 536870912, %v235_v53 }
  0xe2   :  { %v237_v54 = vshrl.u32 %v236_v45, 30  ;;  %519 = vmatpush.bf16.msra.mxu1 %v614_v20  ;;  %v633_v45 = vld [vmem:[%s902_s3 + $0x2] ss:$0 sm:$0xff] }
  0xe4   :  { %v238_v55 = vshll.u32 %v237_v54, 30  ;;  %v261_v23 = vsub.s32 4, %v237_v54 }
  0xe6   :  { %v239_v46 = vsub.s32 %v235_v53, %v238_v55  ;;  %v262_v32 = vsel %vm139_vm12, %v261_v23, %v237_v54  ;;  %520 = vmatpush.bf16.msra.mxu1 %v613_v27 }
  0xe7   :  { %v264_v36 = vsel %vm807_vm13, 0, %v262_v32 }
  0xe8   :  { %vm240_vm10 = vcmp.lt.s32.totalorder %v239_v46, 0  ;;  %v241_v56 = vsub.s32 0, %v239_v46  ;;  %v281_v47 = vand.u32 3, %v264_v36 }
  0xea   :  { %v242_v57 = vsel %vm240_vm10, %v241_v56, %v239_v46  ;;  %521 = vmatpush.bf16.msra.mxu1 %v612_v39  ;;  %vm283_vm14 = vcmp.eq.s32.totalorder %v281_v47, 0  ;;  %vm286_vm15 = vcmp.eq.s32.totalorder %v281_v47, 2  ;;  %vm282_vm0 = vcmp.lt.s32.totalorder %v281_v47, 2 }
  0xeb   :  { %v243_v58 = vclz %v242_v57 }
  0xed   :  { %v567_v59 = vadd.s32 4294967294, %v243_v58 }
  0xef   :  { %vm568_vm11 = vcmp.lt.s32.totalorder %v567_v59, 0 }
  0xf0   :  { %v246_v60 = vsel %vm568_vm11, 0, %v567_v59 }
  0xf1   :  { %v247_v61 = vsub.s32 32, %v246_v60  ;;  %v251_v62 = vsub.s32 4294967266, %v246_v60  ;;  %v248_v0 = vshll.u32 %v239_v46, %v246_v60 }
  0xf3   :  { %v249_v1 = vshrl.u32 %v231_v28, %v247_v61  ;;  %v252_v50 = vadd.s32 127, %v251_v62 }
  0xf5   :  { %v250_v3 = vor.u32 %v249_v1, %v248_v0  ;;  %v253_v4 = vshll.u32 %v252_v50, 23 }
  0xf7   :  { %v254_v5 = vor.u32 4788187, %v253_v4  ;;  %v257_v8 = vcvt.s32.f32 %v250_v3 }
  0xf9   :  { %v255_v7 = vand.u32 2147483647, %v254_v5 }
  0xfb   :  { %v258_v9 = vmul.f32 %v257_v8, %v255_v7 }
  0xfd   :  { %v259_v11 = vxor.u32 2147483648, %v258_v9 }
  0xff   :  { %v260_v14 = vsel %vm139_vm12, %v259_v11, %v258_v9 }
 0x100   :  { %v263_v16 = vsel %vm807_vm13, %v740_v17, %v260_v14 }
 0x101   :  { %v265_v18 = vmul.f32 %v263_v16, %v263_v16 }
 0x103   :  { %v273_v19 = vmul.f32 -0.00019511016, %v265_v18  ;;  %v266_v22 = vmul.f32 -0.001358992, %v265_v18 }
 0x105   :  { %v274_v24 = vadd.f32 0.008332121, %v273_v19  ;;  %v267_v21 = vadd.f32 0.041655596, %v266_v22 }
 0x107   :  { %v275_v25 = vmul.f32 %v274_v24, %v265_v18  ;;  %v268_v30 = vmul.f32 %v267_v21, %v265_v18 }
 0x109   :  { %v276_v33 = vadd.f32 -0.16666654, %v275_v25  ;;  %v269_v35 = vadd.f32 -0.4999988, %v268_v30 }
 0x10b   :  { %v277_v38 = vmul.f32 %v276_v33, %v265_v18  ;;  %v270_v41 = vmul.f32 %v269_v35, %v265_v18 }
 0x10d   :  { %v278_v42 = vadd.f32 1.0, %v277_v38  ;;  %v271_v44 = vadd.f32 1.0, %v270_v41 }
 0x10f   :  { %v279_v26 = vmul.f32 %v278_v42, %v263_v16  ;;  %v287_v48 = vxor.u32 2147483648, %v271_v44 }
 0x111   :  { %v284_v49 = vxor.u32 2147483648, %v279_v26  ;;  %v288_v52 = vsel %vm286_vm15, %v287_v48, %v279_v26 }
 0x113   :  { %v285_v51 = vsel %vm283_vm14, %v271_v44, %v284_v49 }
 0x114   :  { %v289_v53 = vsel %vm282_vm0, %v285_v51, %v288_v52 }
 0x115   :  { %v290_v54 = vsel %vm280_vm1, nan, %v289_v53 }
 0x116   :  { %v291_v55 = vmul.f32 1.5707964, %v290_v54 }
 0x118   :  { %v824_v46 = vadd.f32 %v633_v45, %v291_v55 }
 0x11a   :  { %v297_v56 = vand.u32 2139095040, %v824_v46  ;;  %v294_v59 = vand.u32 2147483647, %v824_v46  ;;  %vm296_vm14 = vcmp.lt.s32.totalorder %v824_v46, 0 }
 0x11c   :  { %v298_v57 = vshrl.u32 %v297_v56, 23  ;;  %v301_v17 = vand.u32 8388607, %v294_v59  ;;  %vm883_vm15 = vcmp.le.f32.partialorder %v294_v59, 0.7853982 }
 0x11e   :  { %v569_v58 = vadd.s32 4294967169, %v298_v57  ;;  %v302_v63 = vor.u32 8388608, %v301_v17 }
 0x120   :  { %v304_v60 = vadd.s32 1, %v569_v58 }
 0x122   :  { %vm305_vm2 = vcmp.gt.s32.totalorder %v304_v60, 0 }
 0x123   :  { %v306_v28 = vsel %vm305_vm2, %v304_v60, 0 }
 0x124   :  { %v308_v61 = vand.u32 31, %v306_v28  ;;  %v830_v0 = vshrl.u32 %v306_v28, 5 }
 0x126   :  { %v309_v62 = vsub.s32 32, %v308_v61  ;;  %v311_v1 = vshll.u32 %v693_v29, %v308_v61  ;;  %v314_v50 = vshll.u32 %v694_v31, %v308_v61  ;;  %v317_v4 = vshll.u32 %v695_v34, %v308_v61 }
 0x127   :  { %v320_v6 = vshll.u32 %v696_v37, %v308_v61  ;;  %v323_v8 = vshll.u32 %v697_v40, %v308_v61  ;;  %vm326_vm3 = vcmp.lt.s32.totalorder %v830_v0, 1  ;;  %vm329_vm4 = vcmp.lt.s32.totalorder %v830_v0, 4 }
 0x128   :  { %v312_v2 = vshrl.u32 %v694_v31, %v309_v62  ;;  %v315_v3 = vshrl.u32 %v695_v34, %v309_v62  ;;  %v318_v5 = vshrl.u32 %v696_v37, %v309_v62  ;;  %v321_v7 = vshrl.u32 %v697_v40, %v309_v62 }
 0x129   :  { %v324_v9 = vshrl.u32 %v698_v43, %v309_v62  ;;  %v843_v31 = vshll.u32 %v302_v63, 8  ;;  %vm328_vm5 = vcmp.lt.s32.totalorder %v830_v0, 3  ;;  %vm327_vm6 = vcmp.lt.s32.totalorder %v830_v0, 2 }
 0x12a   :  { %v313_v10 = vor.u32 %v312_v2, %v311_v1  ;;  %v316_v11 = vor.u32 %v315_v3, %v314_v50  ;;  %v319_v12 = vor.u32 %v318_v5, %v317_v4  ;;  %v322_v14 = vor.u32 %v321_v7, %v320_v6 }
 0x12b   :  { %v325_v15 = vor.u32 %v324_v9, %v323_v8  ;;  %v343_v22 = vand.u32 65535, %v843_v31  ;;  %v344_v23 = vshrl.u32 %v843_v31, 16  ;;  %v310_v56 = vshrl.u32 %v693_v29, %v309_v62 }
 0x12c   :  { %v334_v34 = vsel %vm326_vm3, %v313_v10, %v316_v11  ;;  %v338_v37 = vsel %vm326_vm3, %v316_v11, %v319_v12  ;;  %v335_v40 = vsel %vm329_vm4, %v322_v14, 920167782  ;;  %v331_v45 = vsel %vm329_vm4, %v319_v12, 2102212464 }
 0x12d   :  { %v339_v43 = vsel %vm329_vm4, %v325_v15, 1326507024  ;;  %v336_v16 = vsel %vm328_vm5, %v319_v12, %v335_v40  ;;  %v330_v61 = vsel %vm326_vm3, %v310_v56, %v313_v10  ;;  %v332_v63 = vsel %vm328_vm5, %v316_v11, %v331_v45 }
 0x12e   :  { %v340_v18 = vsel %vm328_vm5, %v322_v14, %v339_v43  ;;  %v337_v19 = vsel %vm327_vm6, %v334_v34, %v336_v16  ;;  %v333_v29 = vsel %vm327_vm6, %v330_v61, %v332_v63  ;;  %vm437_vm3 = vweird.f32 %v824_v46  ;;  %v634_v63 = vld [vmem:[%s902_s3 + $0x3] ss:$0 sm:$0xff] }
 0x12f   :  { %v341_v20 = vsel %vm327_vm6, %v338_v37, %v340_v18  ;;  %v367_v25 = vand.u32 65535, %v337_v19  ;;  %v368_v27 = vshrl.u32 %v337_v19, 16  ;;  %v387_v6 = vmul.u32 %v843_v31, %v333_v29 }
 0x130   :  { %v345_v24 = vand.u32 65535, %v341_v20  ;;  %v346_v21 = vshrl.u32 %v341_v20, 16 }
 0x131   :  { %v370_v33 = vmul.u32 %v368_v27, %v343_v22  ;;  %v371_v35 = vmul.u32 %v367_v25, %v344_v23  ;;  %v369_v41 = vmul.u32 %v367_v25, %v343_v22  ;;  %v372_v26 = vmul.u32 %v368_v27, %v344_v23 }
 0x132   :  { %v348_v30 = vmul.u32 %v346_v21, %v343_v22  ;;  %v349_v32 = vmul.u32 %v345_v24, %v344_v23  ;;  %v347_v36 = vmul.u32 %v345_v24, %v343_v22  ;;  %v350_v39 = vmul.u32 %v346_v21, %v344_v23 }
 0x133   :  { %v373_v42 = vshll.u32 %v370_v33, 16  ;;  %v375_v49 = vshll.u32 %v371_v35, 16  ;;  %v374_v17 = vshrl.u32 %v370_v33, 16  ;;  %v376_v2 = vshrl.u32 %v371_v35, 16 }
 0x134   :  { %v351_v38 = vshll.u32 %v348_v30, 16  ;;  %v353_v44 = vshll.u32 %v349_v32, 16  ;;  %v352_v57 = vshrl.u32 %v348_v30, 16  ;;  %v354_v1 = vshrl.u32 %v349_v32, 16 }
 0x135   :  { %vm377_vm8 = vc.u32 %v369_v41, %v373_v42  ;;  %v379_v51 = vadd.s32 %v373_v42, %v369_v41 }
 0x136   :  { %vm355_vm7 = vc.u32 %v347_v36, %v351_v38  ;;  %v357_v47 = vadd.s32 %v351_v38, %v347_v36  ;;  %v378_v53 = vsel %vm377_vm8, 1, %v699_v13 }
 0x137   :  { %v356_v48 = vsel %vm355_vm7, 1, %v699_v13  ;;  %v380_v55 = vadd.s32 %v378_v53, %v372_v26  ;;  %vm381_vm10 = vc.u32 %v379_v51, %v375_v49  ;;  %v383_v5 = vadd.s32 %v379_v51, %v375_v49 }
 0x138   :  { %v358_v52 = vadd.s32 %v356_v48, %v350_v39  ;;  %vm359_vm9 = vc.u32 %v357_v47, %v353_v44  ;;  %v382_v60 = vsel %vm381_vm10, 1, %v699_v13 }
 0x139   :  { %v360_v54 = vsel %vm359_vm9, 1, %v699_v13  ;;  %v384_v28 = vadd.s32 %v382_v60, %v380_v55 }
 0x13a   :  { %v362_v58 = vadd.s32 %v360_v54, %v358_v52 }
 0x13b   :  { %v385_v3 = vadd.s32 %v384_v28, %v374_v17 }
 0x13c   :  { %v363_v50 = vadd.s32 %v362_v58, %v352_v57 }
 0x13d   :  { %v386_v62 = vadd.s32 %v385_v3, %v376_v2 }
 0x13e   :  { %v364_v4 = vadd.s32 %v363_v50, %v354_v1 }
 0x13f   :  { %v390_v13 = vadd.s32 1, %v386_v62 }
 0x140   :  { %vm389_vm11 = vc.u32 %v364_v4, %v383_v5  ;;  %v388_v0 = vadd.s32 %v383_v5, %v364_v4 }
 0x141   :  { %v391_v7 = vsel %vm389_vm11, %v390_v13, %v386_v62 }
 0x142   :  { %v392_v8 = vadd.s32 %v391_v7, %v387_v6 }
 0x144   :  { %v393_v9 = vadd.s32 536870912, %v392_v8 }
 0x146   :  { %v394_v10 = vshrl.u32 %v393_v9, 30 }
 0x148   :  { %v395_v12 = vshll.u32 %v394_v10, 30  ;;  %v418_v39 = vsub.s32 4, %v394_v10 }
 0x14a   :  { %v396_v11 = vsub.s32 %v392_v8, %v395_v12  ;;  %v419_v26 = vsel %vm296_vm14, %v418_v39, %v394_v10 }
 0x14b   :  { %v421_v59 = vsel %vm883_vm15, 0, %v419_v26 }
 0x14c   :  { %vm397_vm12 = vcmp.lt.s32.totalorder %v396_v11, 0  ;;  %v398_v14 = vsub.s32 0, %v396_v11  ;;  %v438_v54 = vand.u32 3, %v421_v59 }
 0x14e   :  { %v399_v15 = vsel %vm397_vm12, %v398_v14, %v396_v11  ;;  %vm440_vm0 = vcmp.eq.s32.totalorder %v438_v54, 0  ;;  %vm443_vm1 = vcmp.eq.s32.totalorder %v438_v54, 2  ;;  %vm439_vm2 = vcmp.lt.s32.totalorder %v438_v54, 2 }
 0x14f   :  { %v400_v34 = vclz %v399_v15 }
 0x151   :  { %v570_v37 = vadd.s32 4294967294, %v400_v34 }
 0x153   :  { %vm571_vm13 = vcmp.lt.s32.totalorder %v570_v37, 0 }
 0x154   :  { %v403_v40 = vsel %vm571_vm13, 0, %v570_v37 }
 0x155   :  { %v404_v43 = vsub.s32 32, %v403_v40  ;;  %v408_v16 = vsub.s32 4294967266, %v403_v40  ;;  %v405_v18 = vshll.u32 %v396_v11, %v403_v40 }
 0x157   :  { %v406_v19 = vshrl.u32 %v388_v0, %v404_v43  ;;  %v409_v20 = vadd.s32 127, %v408_v16 }
 0x159   :  { %v407_v31 = vor.u32 %v406_v19, %v405_v18  ;;  %v410_v22 = vshll.u32 %v409_v20, 23 }
 0x15b   :  { %v411_v23 = vor.u32 4788187, %v410_v22  ;;  %v414_v21 = vcvt.s32.f32 %v407_v31 }
 0x15d   :  { %v412_v24 = vand.u32 2147483647, %v411_v23 }
 0x15f   :  { %v415_v25 = vmul.f32 %v414_v21, %v412_v24 }
 0x161   :  { %v416_v27 = vxor.u32 2147483648, %v415_v25 }
 0x163   :  { %v417_v32 = vsel %vm296_vm14, %v416_v27, %v415_v25 }
 0x164   :  { %v420_v33 = vsel %vm883_vm15, %v824_v46, %v417_v32 }
 0x165   :  { %v422_v35 = vmul.f32 %v420_v33, %v420_v33 }
 0x167   :  { %v423_v36 = vmul.f32 -0.001358992, %v422_v35  ;;  %v430_v38 = vmul.f32 -0.00019511016, %v422_v35 }
 0x169   :  { %v424_v41 = vadd.f32 0.041655596, %v423_v36  ;;  %v431_v42 = vadd.f32 0.008332121, %v430_v38 }
 0x16b   :  { %v425_v44 = vmul.f32 %v424_v41, %v422_v35  ;;  %v432_v47 = vmul.f32 %v431_v42, %v422_v35 }
 0x16d   :  { %v426_v48 = vadd.f32 -0.4999988, %v425_v44  ;;  %v433_v49 = vadd.f32 -0.16666654, %v432_v47 }
 0x16f   :  { %v427_v51 = vmul.f32 %v426_v48, %v422_v35  ;;  %v434_v52 = vmul.f32 %v433_v49, %v422_v35 }
 0x171   :  { %v428_v53 = vadd.f32 1.0, %v427_v51  ;;  %v435_v45 = vadd.f32 1.0, %v434_v52 }
 0x173   :  { %v436_v55 = vmul.f32 %v435_v45, %v420_v33  ;;  %v444_v56 = vxor.u32 2147483648, %v428_v53 }
 0x175   :  { %v441_v57 = vxor.u32 2147483648, %v436_v55  ;;  %v445_v60 = vsel %vm443_vm1, %v444_v56, %v436_v55 }
 0x177   :  { %v442_v58 = vsel %vm440_vm0, %v428_v53, %v441_v57 }
 0x178   :  { %v446_v17 = vsel %vm439_vm2, %v442_v58, %v445_v60 }
 0x179   :  { %v447_v28 = vsel %vm437_vm3, nan, %v446_v17 }
 0x17a   :  { %v448_v61 = vpack.c.bf16 %v447_v28, %v447_v28 }
 0x17c   :  { %522 = vmatmul.bf16.vlgmr.msra.gmra.mxu1 %v448_v61 }
 0x1f9   :  { %v523_v1 = vpop.f32.mrf.mxu1 }
 0x1fa   :  { %v524_v50 = vadd.f32 %v634_v63, %v523_v1 }
 0x1fc   :  { %527 = vst [vmem:[%s903_s4] sm:$0xff] %v524_v50 }
 0x201   :  { %v525_v2 = vpop.f32.mrf.mxu1 }
 0x202   :  { %532 = vsyncpa [#allocation3], 1 }
 0x203   :  { %533 = vsyncpa [#allocation5], 1 }

</bundles_post_ra>
